<compile_context>
chip_gen: v6e
topology: v6e:2x2x1
jax: 0.10.0
libtpu: 0.0.40
codegen_flags: <defaults>
</compile_context>

<pallas_src>
import jax
import jax.numpy as jnp
from jax.experimental import pallas as pl
from jax.experimental.pallas import tpu as pltpu


# Lane-dense tiling constants.
_LANE = 512            # last-dim width: multiple of 128 -> unmasked vector stores
_TILE_R_MAX = 1024     # 1024 x 512 x 4 B = 2 MiB per f32 block


def _round_up(n, m):
    return ((n + m - 1) // m) * m


def _scheduler_net_kernel(params_ref, x_ref, o_ref):
    # params_ref: SMEM (4,) f32 = [w1, b1, w2, b2]
    w1 = params_ref[0]
    b1 = params_ref[1]
    w2 = params_ref[2]
    b2 = params_ref[3]
    x = x_ref[...]
    h = jnp.maximum(x * w1 + b1, 0.0)   # conv1 (1x1, 1ch) + ReLU
    o_ref[...] = h * w2 + b2            # conv2 (1x1, 1ch)


def scheduler_test_net(x_nchw, w1, b1, w2, b2):
    """Forward pass of SchedulerTestNet.

    x_nchw: (N, 1, H, W) float32
    w1, b1, w2, b2: scalar float32 params (1x1 conv weights / biases).
    Returns (N, 1, H, W) float32.
    """
    N, C, H, W = x_nchw.shape
    assert C == 1, "SchedulerTestNet uses single-channel 1x1 convs"

    if x_nchw.dtype != jnp.float32:
        x_nchw = x_nchw.astype(jnp.float32)

    total = N * C * H * W

    # Lane-dense layout: flatten everything, pack LANE elements per row.
    rows = -(-total // _LANE)                       # cdiv(total, LANE)
    if rows <= _TILE_R_MAX:
        tile_r = _round_up(rows, 8)                 # sublane-aligned single tile
    else:
        tile_r = _TILE_R_MAX
    rows_padded = _round_up(rows, tile_r)
    padded_total = rows_padded * _LANE

    x_flat = jnp.ravel(x_nchw)
    if padded_total != total:
        x_flat = jnp.pad(x_flat, (0, padded_total - total))
    x2d = x_flat.reshape(rows_padded, _LANE)

    params = jnp.stack([w1, b1, w2, b2]).astype(jnp.float32)

    grid = (rows_padded // tile_r,)

    out2d = pl.pallas_call(
        _scheduler_net_kernel,
        out_shape=jax.ShapeDtypeStruct((rows_padded, _LANE), jnp.float32),
        grid=grid,
        in_specs=[
            pl.BlockSpec(memory_space=pltpu.SMEM),              # scalar params
            pl.BlockSpec((tile_r, _LANE), lambda i: (i, 0)),    # lane-dense tiles
        ],
        out_specs=pl.BlockSpec((tile_r, _LANE), lambda i: (i, 0)),
        compiler_params=pltpu.CompilerParams(
            dimension_semantics=("parallel",),
        ),
    )(params, x2d)

    out_flat = jnp.ravel(out2d)[:total]
    return out_flat.reshape(N, C, H, W)


def _reference(x_nchw, w1, b1, w2, b2):
    h = jnp.maximum(x_nchw * w1 + b1, 0.0)
    return h * w2 + b2


if __name__ == "__main__":
    key = jax.random.PRNGKey(0)
    kx, k1, k2, k3, k4 = jax.random.split(key, 5)

    # Small NCHW input consistent with Conv2d(1, 1, 1): batch=2, C=1, 16x16.
    x = jax.random.normal(kx, (2, 1, 16, 16), dtype=jnp.float32)

    # Deterministic parameter init mimicking PyTorch Conv2d default
    # (uniform in [-1/sqrt(fan_in), 1/sqrt(fan_in)] with fan_in = 1*1*1 = 1).
    w1 = jax.random.uniform(k1, (), minval=-1.0, maxval=1.0, dtype=jnp.float32)
    b1 = jax.random.uniform(k2, (), minval=-1.0, maxval=1.0, dtype=jnp.float32)
    w2 = jax.random.uniform(k3, (), minval=-1.0, maxval=1.0, dtype=jnp.float32)
    b2 = jax.random.uniform(k4, (), minval=-1.0, maxval=1.0, dtype=jnp.float32)

    out = scheduler_test_net(x, w1, b1, w2, b2)
    out = jax.block_until_ready(out)

    ref = _reference(x, w1, b1, w2, b2)
    assert out.shape == x.shape
    assert out.dtype == jnp.float32
    assert jnp.allclose(out, ref, atol=1e-6, rtol=1e-6), "mismatch vs reference"

    print("KERNEL_OK")
</pallas_src>

<mosaic_0001>
module attributes {stable_mosaic.version = 11 : i64} {
  func.func @_scheduler_net_kernel(%arg0: i32, %arg1: memref<4xf32, #tpu.memory_space<smem>>, %arg2: memref<8x512xf32, #tpu.memory_space<vmem>>, %arg3: memref<8x512xf32, #tpu.memory_space<vmem>>) attributes {dimension_semantics = [#tpu.dimension_semantics<parallel>], iteration_bounds = array<i64: 1>, scalar_prefetch = 0 : i64, scratch_operands = 0 : i64, tpu.core_type = #tpu.core_type<tc>, window_params = [{transform_indices = @transform_0, window_bounds = array<i64: 4>}, {transform_indices = @transform_1, window_bounds = array<i64: 8, 512>}, {transform_indices = @transform_2, window_bounds = array<i64: 8, 512>}]} {
    %c0 = arith.constant 0 : index
    %0 = memref.load %arg1[%c0] : memref<4xf32, #tpu.memory_space<smem>>
    %c1 = arith.constant 1 : index
    %1 = memref.load %arg1[%c1] : memref<4xf32, #tpu.memory_space<smem>>
    %c2 = arith.constant 2 : index
    %2 = memref.load %arg1[%c2] : memref<4xf32, #tpu.memory_space<smem>>
    %c3 = arith.constant 3 : index
    %3 = memref.load %arg1[%c3] : memref<4xf32, #tpu.memory_space<smem>>
    %c0_0 = arith.constant 0 : index
    %c0_1 = arith.constant 0 : index
    %4 = vector.load %arg2[%c0_0, %c0_1] : memref<8x512xf32, #tpu.memory_space<vmem>>, vector<8x512xf32>
    %5 = vector.broadcast %0 : f32 to vector<8x512xf32>
    %6 = arith.mulf %4, %5 : vector<8x512xf32>
    %7 = vector.broadcast %1 : f32 to vector<8x512xf32>
    %8 = arith.addf %6, %7 : vector<8x512xf32>
    %cst = arith.constant 0.000000e+00 : f32
    %9 = vector.broadcast %cst : f32 to vector<8x512xf32>
    %10 = arith.maximumf %8, %9 : vector<8x512xf32>
    %11 = vector.broadcast %2 : f32 to vector<8x512xf32>
    %12 = arith.mulf %10, %11 : vector<8x512xf32>
    %13 = vector.broadcast %3 : f32 to vector<8x512xf32>
    %14 = arith.addf %12, %13 : vector<8x512xf32>
    %c0_2 = arith.constant 0 : index
    %c0_3 = arith.constant 0 : index
    %15 = vector.load %arg3[%c0_2, %c0_3] : memref<8x512xf32, #tpu.memory_space<vmem>>, vector<8x512xf32>
    tpu.vector_store %arg3[%c0_2, %c0_3], %14 {strides = array<i32>} : memref<8x512xf32, #tpu.memory_space<vmem>>, vector<8x512xf32>,
    return
  }
  func.func @transform_0(%arg0: i32) -> i32 {
    %c0_i32 = arith.constant 0 : i32
    %c0_i32_0 = arith.constant 0 : i32
    return %c0_i32 : i32
  }
  func.func @transform_1(%arg0: i32) -> (i32, i32) {
    %c0_i32 = arith.constant 0 : i32
    %c0_i32_0 = arith.constant 0 : i32
    return %arg0, %c0_i32 : i32, i32
  }
  func.func @transform_2(%arg0: i32) -> (i32, i32) {
    %c0_i32 = arith.constant 0 : i32
    %c0_i32_0 = arith.constant 0 : i32
    return %arg0, %c0_i32 : i32, i32
  }
}

</mosaic_0001>

<bundles_post_ra>
// kernel: tpu_custom_call.1
= control target key start
LH: loop header
LB: loop body
LE: loop exit
PB: predicated region body
PF: predicated region fallthrough
CT: control target
= control target key end

     0   :  { %7 = vsyncpa [#allocation5], 0  ;;  %s174_s0 = inlined_call_operand.hbm [shape: f32[4], index: 0, kind: input, shape index: {}]   ;;  %s175_s1 = inlined_call_operand.hbm [shape: f32[8,512], index: 1, kind: input, shape index: {}]   ;;  %s176_s2 = inlined_call_operand.hbm [shape: f32[8,512], index: 2, kind: output, shape index: {}]  }
   0x1   :  { %8 = vsyncpa [#allocation3], 0 }
   0x2   :  { %9 = vsyncpa [#allocation4], 0  ;;  %s147_s9 = smov [#allocation2]   ;;  %s148_s12 = smov [#allocation6]  }
   0x3   :  { %17 = dma.hbm_to_smem %s174_s0, 16, %s147_s9, [#allocation5]  }
   0x4   :  { %s24_s13 = sshll.u32 %s148_s12, 4  ;;  %s25_s13 = int_to_ptr.vmem [resolvable:$true] %s24_s13 }
   0x5   :  { %s109_s14 = scalar_lea.vmem %s25_s13, 512  ;;  %p114_p1 = scmp.lt.s32.totalorder %s25_s13, %s25_s13 }
   0x6   :  { %p110_p0 = scmp.ne.s32.totalorder %s25_s13, %s109_s14  ;;  %p115_p2 = scmp.lt.s32.totalorder %s109_s14, %s109_s14 }
   0x8   :  { %p116_p3 = por %p115_p2, %p114_p1 }
   0xa   :  { %p117_p4 = pnand %p116_p3, %p110_p0 }
   0xc   :  { %120 = shalt.err (!%p117_p4)
}
   0xd   :  { %27 = dma.hbm_to_vmem [thread:$0]  %s175_s1, 512, %s25_s13, [#allocation3]  }
   0xe   :  { %141 = dma.done.wait [#allocation5], 16  }
   0xf   :  { %142 = vsyncadd [#allocation5], 4294967280 }
  0x10   :  { %143 = dma.done.wait [#allocation3], 512  }
  0x11   :  { %144 = vsyncadd [#allocation3], 4294966784 }
  0x12   :  { %34 = sfence }
  0x13   :  { %s35_s0 = sld [smem:[#allocation2]]  ;;  %v39_v0 = vld [vmem:[#allocation6] sm:$0xff]  ;;  %v40_v1 = vld [vmem:[#allocation6 + $0x8] sm:$0xff]  ;;  %v41_v2 = vld [vmem:[#allocation6 + $0x10] sm:$0xff]  ;;  %s149_s1 = smov [#allocation7]  }
  0x14   :  { %s87_s17 = sld [smem:[#allocation2 + $0x1]]  ;;  %v42_v3 = vld [vmem:[#allocation6 + $0x18] sm:$0xff]  ;;  %s77_s20 = sshll.u32 %s149_s1, 4  ;;  %s78_s20 = int_to_ptr.vmem [resolvable:$true] %s77_s20 }
  0x15   :  { %s88_s18 = sld [smem:[#allocation2 + $0x2]]  ;;  %s121_s21 = scalar_lea.vmem %s78_s20, 512 }
  0x16   :  { %s89_s19 = sld [smem:[#allocation2 + $0x3]]  ;;  %p122_p5 = scmp.ne.s32.totalorder %s78_s20, %s121_s21 }
  0x17   :  { %p126_p6 = scmp.lt.s32.totalorder %s78_s20, %s78_s20  ;;  %p127_p7 = scmp.lt.s32.totalorder %s121_s21, %s121_s21 }
  0x19   :  { %v43_v4 = vstv %s35_s0  ;;  %p128_p8 = por %p127_p7, %p126_p6 }
  0x1a   :  { %v44_v5 = vmul.f32 %v43_v4, %v39_v0  ;;  %v48_v6 = vstv %s87_s17  ;;  %v45_v7 = vmul.f32 %v43_v4, %v40_v1  ;;  %v46_v8 = vmul.f32 %v43_v4, %v41_v2 }
  0x1b   :  { %v47_v9 = vmul.f32 %v43_v4, %v42_v3  ;;  %v57_v13 = vstv %s88_s18  ;;  %p129_p9 = pnand %p128_p8, %p122_p5 }
  0x1c   :  { %v49_v10 = vadd.f32 %v48_v6, %v44_v5  ;;  %v50_v11 = vadd.f32 %v48_v6, %v45_v7  ;;  %v51_v12 = vadd.f32 %v48_v6, %v46_v8  ;;  %v62_v18 = vstv %s89_s19 }
  0x1d   :  { %v52_v14 = vadd.f32 %v48_v6, %v47_v9 }
  0x1e   :  { %v53_v15 = vmax.f32 %v49_v10, 0.0  ;;  %v54_v16 = vmax.f32 %v50_v11, 0.0  ;;  %v55_v17 = vmax.f32 %v51_v12, 0.0 }
  0x1f   :  { %v56_v19 = vmax.f32 %v52_v14, 0.0 }
  0x20   :  { %v58_v20 = vmul.f32 %v57_v13, %v53_v15  ;;  %v59_v21 = vmul.f32 %v57_v13, %v54_v16  ;;  %v60_v22 = vmul.f32 %v57_v13, %v55_v17 }
  0x21   :  { %v61_v23 = vmul.f32 %v57_v13, %v56_v19 }
  0x22   :  { %v63_v24 = vadd.f32 %v62_v18, %v58_v20  ;;  %v64_v25 = vadd.f32 %v62_v18, %v59_v21  ;;  %v65_v26 = vadd.f32 %v62_v18, %v60_v22 }
  0x23   :  { %v66_v27 = vadd.f32 %v62_v18, %v61_v23 }
  0x24   :  { %67 = vst [vmem:[#allocation7] sm:$0xff] %v63_v24  ;;  %68 = vst [vmem:[#allocation7 + $0x8] sm:$0xff] %v64_v25 }
  0x25   :  { %69 = vst [vmem:[#allocation7 + $0x10] sm:$0xff] %v65_v26  ;;  %70 = vst [vmem:[#allocation7 + $0x18] sm:$0xff] %v66_v27 }
  0x26   :  { %132 = shalt.err (!%p129_p9)
}
  0x27   :  { %80 = dma.vmem_to_hbm [thread:$0]  %s78_s20, 512, %s176_s2, [#allocation4]  }
  0x28   :  { %145 = dma.done.wait [#allocation4], 512  }
  0x29   :  { %146 = vsyncadd [#allocation4], 4294966784 }
  0x2a   :  { %84 = vsyncpa [#allocation3], 1 }
  0x2b   :  { %85 = vsyncpa [#allocation4], 1 }
  0x2c   :  { %86 = vsyncpa [#allocation5], 1 }

</bundles_post_ra>
